<compile_context>
chip_gen: v5e
topology: v5e:2x2
jax: 0.10.0
libtpu: 0.0.40
codegen_flags: <defaults>
</compile_context>

<pallas_src>
import jax
import jax.numpy as jnp
from jax.experimental import pallas as pl
from jax.experimental.pallas import tpu as pltpu


# ----------------------------------------------------------------------------
# Tiling configuration (memory-bound elementwise / reduction kernels)
# ----------------------------------------------------------------------------
_TARGET_BLOCK_ELEMS = 1 << 20          # 1M elements = 4 MiB per f32 tile
_FLAG_BLOCK = (8, 128)                 # one int32 (8,128) flag block per grid step
_VMEM_LIMIT = 32 * 1024 * 1024
_MIN_PALLAS_ELEMS = 128


def _pick_lanes(n):
    """Largest lane width (multiple of 128) that divides n, else None."""
    for lanes in (2048, 1024, 512, 256, 128):
        if n % lanes == 0:
            return lanes
    return None


def _tile_rows(rows, lanes):
    """Row-block size targeting ~4 MiB tiles (whole array if smaller)."""
    bm = max(8, _TARGET_BLOCK_ELEMS // lanes)   # multiple of 32 for lanes <= 2048
    return rows if rows <= bm else bm


# ----------------------------------------------------------------------------
# Pallas kernels
# ----------------------------------------------------------------------------
def _prox_kernel(x_ref, y_ref):
    # Elementwise projection onto {x >= 0}.  A ragged last row-block is safe:
    # Pallas discards out-of-bounds stores, so no masking is needed here.
    y_ref[...] = jnp.maximum(x_ref[...], 0).astype(y_ref.dtype)


def _make_check_kernel(rows, bm):
    """Per-block feasibility flag: all(x >= 0) over the valid rows of the block."""
    ragged = (rows % bm) != 0

    def kernel(x_ref, flag_ref):
        ok_map = x_ref[...] >= 0
        if ragged:
            i = pl.program_id(0)
            row_ids = jax.lax.broadcasted_iota(jnp.int32, ok_map.shape, 0)
            # Rows past the end of the array count as satisfied.
            ok_map = jnp.logical_or(ok_map, row_ids >= (rows - i * bm))
        ok = jnp.all(ok_map)
        flag_ref[...] = jnp.where(ok,
                                  jnp.ones(flag_ref.shape, jnp.int32),
                                  jnp.zeros(flag_ref.shape, jnp.int32))

    return kernel


def _make_prox_and_check_kernel(rows, bm):
    """Fused single pass: project the tile AND emit its feasibility flag."""
    ragged = (rows % bm) != 0

    def kernel(x_ref, y_ref, flag_ref):
        x = x_ref[...]
        y_ref[...] = jnp.maximum(x, 0).astype(y_ref.dtype)
        ok_map = x >= 0
        if ragged:
            i = pl.program_id(0)
            row_ids = jax.lax.broadcasted_iota(jnp.int32, ok_map.shape, 0)
            ok_map = jnp.logical_or(ok_map, row_ids >= (rows - i * bm))
        ok = jnp.all(ok_map)
        flag_ref[...] = jnp.where(ok,
                                  jnp.ones(flag_ref.shape, jnp.int32),
                                  jnp.zeros(flag_ref.shape, jnp.int32))

    return kernel


# ----------------------------------------------------------------------------
# pallas_call wrappers (operate on a lane-dense (rows, lanes) 2-D view)
# ----------------------------------------------------------------------------
def _prox_2d(x2d):
    rows, lanes = x2d.shape
    bm = _tile_rows(rows, lanes)
    grid = pl.cdiv(rows, bm)
    nbytes = x2d.size * x2d.dtype.itemsize
    return pl.pallas_call(
        _prox_kernel,
        out_shape=jax.ShapeDtypeStruct(x2d.shape, x2d.dtype),
        grid_spec=pltpu.PrefetchScalarGridSpec(
            num_scalar_prefetch=0,
            grid=(grid,),
            in_specs=[pl.BlockSpec((bm, lanes), lambda i: (i, 0))],
            out_specs=pl.BlockSpec((bm, lanes), lambda i: (i, 0)),
        ),
        compiler_params=pltpu.CompilerParams(
            dimension_semantics=("parallel",),
            vmem_limit_bytes=_VMEM_LIMIT,
        ),
        cost_estimate=pl.CostEstimate(
            flops=x2d.size, transcendentals=0, bytes_accessed=2 * nbytes),
    )(x2d)


def _check_2d(x2d):
    rows, lanes = x2d.shape
    bm = _tile_rows(rows, lanes)
    grid = pl.cdiv(rows, bm)
    nbytes = x2d.size * x2d.dtype.itemsize
    flags = pl.pallas_call(
        _make_check_kernel(rows, bm),
        out_shape=jax.ShapeDtypeStruct(
            (_FLAG_BLOCK[0] * grid, _FLAG_BLOCK[1]), jnp.int32),
        grid_spec=pltpu.PrefetchScalarGridSpec(
            num_scalar_prefetch=0,
            grid=(grid,),
            in_specs=[pl.BlockSpec((bm, lanes), lambda i: (i, 0))],
            out_specs=pl.BlockSpec(_FLAG_BLOCK, lambda i: (i, 0)),
        ),
        compiler_params=pltpu.CompilerParams(
            dimension_semantics=("parallel",),   # per-block flags -> megacore OK
            vmem_limit_bytes=_VMEM_LIMIT,
        ),
        cost_estimate=pl.CostEstimate(
            flops=x2d.size, transcendentals=0,
            bytes_accessed=nbytes + 4 * _FLAG_BLOCK[0] * _FLAG_BLOCK[1] * grid),
    )(x2d)
    return jnp.min(flags) > 0


def _prox_and_check_2d(x2d):
    rows, lanes = x2d.shape
    bm = _tile_rows(rows, lanes)
    grid = pl.cdiv(rows, bm)
    nbytes = x2d.size * x2d.dtype.itemsize
    y2d, flags = pl.pallas_call(
        _make_prox_and_check_kernel(rows, bm),
        out_shape=(
            jax.ShapeDtypeStruct(x2d.shape, x2d.dtype),
            jax.ShapeDtypeStruct(
                (_FLAG_BLOCK[0] * grid, _FLAG_BLOCK[1]), jnp.int32),
        ),
        grid_spec=pltpu.PrefetchScalarGridSpec(
            num_scalar_prefetch=0,
            grid=(grid,),
            in_specs=[pl.BlockSpec((bm, lanes), lambda i: (i, 0))],
            out_specs=(
                pl.BlockSpec((bm, lanes), lambda i: (i, 0)),
                pl.BlockSpec(_FLAG_BLOCK, lambda i: (i, 0)),
            ),
        ),
        compiler_params=pltpu.CompilerParams(
            dimension_semantics=("parallel",),
            vmem_limit_bytes=_VMEM_LIMIT,
        ),
        cost_estimate=pl.CostEstimate(
            flops=2 * x2d.size, transcendentals=0, bytes_accessed=2 * nbytes),
    )(x2d)
    return y2d, jnp.min(flags) > 0


# ----------------------------------------------------------------------------
# jitted top-level implementations (no host-side pad / slice round trips)
# ----------------------------------------------------------------------------
@jax.jit
def _nonneg_is_satisfied(x):
    flat = x.reshape(-1)
    n = flat.size
    if n < _MIN_PALLAS_ELEMS:
        return jnp.all(flat >= 0)
    lanes = _pick_lanes(n)
    if lanes is not None:
        return _check_2d(flat.reshape(n // lanes, lanes))
    # Rare ragged case (n not a multiple of 128): Pallas on the aligned body,
    # plain jnp on the <128-element tail.
    main = (n // 128) * 128
    ok_main = _check_2d(flat[:main].reshape(-1, 128))
    ok_tail = jnp.all(flat[main:] >= 0)
    return jnp.logical_and(ok_main, ok_tail)


@jax.jit
def _nonneg_prox(x):
    flat = x.reshape(-1)
    n = flat.size
    if n < _MIN_PALLAS_ELEMS:
        return jnp.maximum(flat, 0).reshape(x.shape)
    lanes = _pick_lanes(n)
    if lanes is not None:
        return _prox_2d(flat.reshape(n // lanes, lanes)).reshape(x.shape)
    # TODO(synk): the <128-element tail is handled outside Pallas; the
    # concatenate costs one extra copy but only triggers for unaligned sizes.
    main = (n // 128) * 128
    y_main = _prox_2d(flat[:main].reshape(-1, 128)).reshape(-1)
    y_tail = jnp.maximum(flat[main:], 0)
    return jnp.concatenate([y_main, y_tail]).reshape(x.shape)


@jax.jit
def _nonneg_prox_and_check(x):
    flat = x.reshape(-1)
    n = flat.size
    if n < _MIN_PALLAS_ELEMS:
        return jnp.maximum(flat, 0).reshape(x.shape), jnp.all(flat >= 0)
    lanes = _pick_lanes(n)
    if lanes is not None:
        y2d, ok = _prox_and_check_2d(flat.reshape(n // lanes, lanes))
        return y2d.reshape(x.shape), ok
    main = (n // 128) * 128
    y_main, ok_main = _prox_and_check_2d(flat[:main].reshape(-1, 128))
    tail = flat[main:]
    y_tail = jnp.maximum(tail, 0)
    ok = jnp.logical_and(ok_main, jnp.all(tail >= 0))
    return jnp.concatenate([y_main.reshape(-1), y_tail]).reshape(x.shape), ok


# ----------------------------------------------------------------------------
# Module mirror
# ----------------------------------------------------------------------------
class Constraint:
    """JAX/Pallas mirror of proxtorch.base.Constraint (abstract base class)."""

    def forward(self, x):
        raise NotImplementedError(
            "Subclasses must implement the 'is_satisfied' method."
        )

    def __call__(self, x):
        return self.forward(x)

    def prox(self, x):
        raise NotImplementedError("Subclasses must implement the 'prox' method.")


# TODO(synk): the base Constraint has no concrete math (it raises); the Pallas
# kernels above implement the canonical constraint hot paths and are exercised
# through this minimal concrete subclass.
class NonNegativeConstraint(Constraint):
    """Example concrete constraint: x >= 0 everywhere."""

    def forward(self, x):
        # Device bool scalar (no forced host sync); callers may bool() it.
        return _nonneg_is_satisfied(x)

    def prox(self, x):
        return _nonneg_prox(x)

    def prox_and_check(self, x):
        """Fused single HBM pass: (prox(x), was-x-already-feasible flag)."""
        return _nonneg_prox_and_check(x)


# ----------------------------------------------------------------------------
# Driver
# ----------------------------------------------------------------------------
if __name__ == "__main__":
    key = jax.random.PRNGKey(0)
    x = jax.random.normal(key, (2, 4, 16, 16), dtype=jnp.float32)  # NCHW

    # The abstract base behaves exactly like PyTorch: forward raises.
    base = Constraint()
    try:
        base(x)
        raise AssertionError("base Constraint.forward should raise")
    except NotImplementedError:
        pass

    constraint = NonNegativeConstraint()

    satisfied_before = constraint(x)                        # tiled reduction kernel
    y = constraint.prox(x)                                  # tiled projection kernel
    y_fused, was_feasible = constraint.prox_and_check(x)    # fused single-pass kernel
    satisfied_after = constraint(y)                         # must be True after projection

    (satisfied_before, y, y_fused, was_feasible, satisfied_after) = (
        jax.block_until_ready(
            (satisfied_before, y, y_fused, was_feasible, satisfied_after)
        )
    )

    # Correctness checks against plain-JAX references.
    ref_ok = bool(jnp.all(x >= 0.0))
    y_expected = jnp.maximum(x, 0.0)
    assert bool(satisfied_before) == ref_ok
    assert bool(was_feasible) == ref_ok
    assert bool(satisfied_after) is True
    assert jnp.allclose(y, y_expected)
    assert jnp.array_equal(y_fused, y_expected)

    print("KERNEL_OK")
</pallas_src>

<mosaic_0001>
module attributes {stable_mosaic.version = 11 : i64} {
  func.func @kernel(%arg0: i32, %arg1: memref<1x2048xf32, #tpu.memory_space<vmem>>, %arg2: memref<8x128xi32, #tpu.memory_space<vmem>>) attributes {dimension_semantics = [#tpu.dimension_semantics<parallel>], iteration_bounds = array<i64: 1>, scalar_prefetch = 0 : i64, scratch_operands = 0 : i64, tpu.core_type = #tpu.core_type<tc>, window_params = [{transform_indices = @transform_0, window_bounds = array<i64: 1, 2048>}, {transform_indices = @transform_1, window_bounds = array<i64: 8, 128>}]} {
    %c0 = arith.constant 0 : index
    %c0_0 = arith.constant 0 : index
    %0 = vector.load %arg1[%c0, %c0_0] : memref<1x2048xf32, #tpu.memory_space<vmem>>, vector<1x2048xf32>
    %cst = arith.constant 0.000000e+00 : f32
    %1 = vector.broadcast %cst : f32 to vector<1x2048xf32>
    %2 = arith.cmpf oge, %0, %1 : vector<1x2048xf32>
    %cst_1 = arith.constant 1.000000e+00 : f32
    %cst_2 = arith.constant 0.000000e+00 : f32
    %3 = vector.broadcast %cst_1 : f32 to vector<1x2048xf32>
    %4 = vector.broadcast %cst_2 : f32 to vector<1x2048xf32>
    %5 = arith.select %2, %3, %4 : vector<1x2048xi1>, vector<1x2048xf32>
    %6 = vector.shape_cast %5 : vector<1x2048xf32> to vector<1x1x2048xf32>
    %cst_3 = arith.constant dense<0x7F800000> : vector<1xf32>
    %7 = vector.multi_reduction <minimumf>, %6, %cst_3 [1, 2] : vector<1x1x2048xf32> to vector<1xf32>
    %8 = vector.shape_cast %7 : vector<1xf32> to vector<1x1x1xf32>
    %9 = vector.extract %8[0, 0, 0] : f32 from vector<1x1x1xf32>
    %cst_4 = arith.constant 0.000000e+00 : f32
    %10 = arith.cmpf ogt, %9, %cst_4 : f32
    %c1_i32 = arith.constant 1 : i32
    %11 = vector.broadcast %c1_i32 : i32 to vector<8x128xi32>
    %c0_i32 = arith.constant 0 : i32
    %12 = vector.broadcast %c0_i32 : i32 to vector<8x128xi32>
    %13 = arith.select %10, %11, %12 : vector<8x128xi32>
    %c0_5 = arith.constant 0 : index
    %c0_6 = arith.constant 0 : index
    %14 = vector.load %arg2[%c0_5, %c0_6] : memref<8x128xi32, #tpu.memory_space<vmem>>, vector<8x128xi32>
    tpu.vector_store %arg2[%c0_5, %c0_6], %13 {strides = array<i32>} : memref<8x128xi32, #tpu.memory_space<vmem>>, vector<8x128xi32>,
    return
  }
  func.func @transform_0(%arg0: i32) -> (i32, i32) {
    %c0_i32 = arith.constant 0 : i32
    %c0_i32_0 = arith.constant 0 : i32
    return %arg0, %c0_i32 : i32, i32
  }
  func.func @transform_1(%arg0: i32) -> (i32, i32) {
    %c0_i32 = arith.constant 0 : i32
    %c0_i32_0 = arith.constant 0 : i32
    return %arg0, %c0_i32 : i32, i32
  }
}

</mosaic_0001>

<bundles_post_ra>
// kernel: _nonneg_is_satisfied.1
= control target key start
LH: loop header
LB: loop body
LE: loop exit
PB: predicated region body
PF: predicated region fallthrough
CT: control target
= control target key end

     0   :  { %v103_v2 = vmov 0.0   ;;  %vm48_vm2 = vcmask 1040384   ;;  %v104_v60 = vmov 0   ;;  %s140_s0 = inlined_call_operand.vmem [shape: f32[1,2048], index: 0, kind: input, shape index: {}]   ;;  %s141_s1 = inlined_call_operand.vmem [shape: s32[8,128], index: 1, kind: output, shape index: {}]  }
   0x1   :  { %v8_v0 = vld [vmem:[%s140_s0] sm:$0xff]  ;;  %v9_v1 = vld [vmem:[%s140_s0 + $0x8] sm:$0xff] }
   0x2   :  { %vm10_vm0 = vcmp.ge.f32.partialorder %v8_v0, 0.0  ;;  %vm11_vm1 = vcmp.ge.f32.partialorder %v9_v1, 0.0 }
   0x3   :  { %v12_v3 = vsel %vm10_vm0, 1.0, %v103_v2  ;;  %v13_v4 = vsel %vm11_vm1, 1.0, %v103_v2 }
   0x4   :  { %v16_v5 = vperm.slane %v12_v3, 0  ;;  %v17_v6 = vperm.slane %v12_v3, 1  ;;  %v18_v7 = vperm.slane %v12_v3, 2  ;;  %v19_v8 = vperm.slane %v12_v3, 3 }
   0x5   :  { %v20_v9 = vperm.slane %v12_v3, 4  ;;  %v21_v10 = vperm.slane %v12_v3, 5  ;;  %v22_v11 = vperm.slane %v12_v3, 6  ;;  %v23_v12 = vperm.slane %v12_v3, 7 }
   0x6   :  { %v24_v13 = vperm.slane %v13_v4, 0  ;;  %v25_v14 = vperm.slane %v13_v4, 1  ;;  %v26_v15 = vperm.slane %v13_v4, 2  ;;  %v27_v16 = vperm.slane %v13_v4, 3 }
   0x7   :  { %v28_v17 = vperm.slane %v13_v4, 4  ;;  %v29_v18 = vperm.slane %v13_v4, 5  ;;  %v30_v19 = vperm.slane %v13_v4, 6  ;;  %v31_v20 = vperm.slane %v13_v4, 7 }
   0x8   :  { %v49_v21 = vsel %vm48_vm2, %v16_v5, inf  ;;  %v50_v22 = vsel %vm48_vm2, %v17_v6, inf  ;;  %v51_v23 = vsel %vm48_vm2, %v18_v7, inf  ;;  %v52_v24 = vsel %vm48_vm2, %v19_v8, inf }
   0x9   :  { %v53_v25 = vsel %vm48_vm2, %v20_v9, inf  ;;  %v55_v26 = vsel %vm48_vm2, %v21_v10, inf  ;;  %v57_v27 = vsel %vm48_vm2, %v22_v11, inf  ;;  %v59_v28 = vsel %vm48_vm2, %v23_v12, inf }
   0xa   :  { %v54_v29 = vmin.f32 %v49_v21, %v53_v25  ;;  %v56_v30 = vmin.f32 %v50_v22, %v55_v26  ;;  %v58_v31 = vmin.f32 %v51_v23, %v57_v27  ;;  %v60_v32 = vmin.f32 %v52_v24, %v59_v28 }
   0xb   :  { %v61_v33 = vsel %vm48_vm2, %v24_v13, inf  ;;  %v63_v34 = vsel %vm48_vm2, %v25_v14, inf  ;;  %v65_v35 = vsel %vm48_vm2, %v26_v15, inf  ;;  %v67_v36 = vsel %vm48_vm2, %v27_v16, inf }
   0xc   :  { %v62_v37 = vmin.f32 %v54_v29, %v61_v33  ;;  %v64_v38 = vmin.f32 %v56_v30, %v63_v34  ;;  %v66_v39 = vmin.f32 %v58_v31, %v65_v35  ;;  %v68_v40 = vmin.f32 %v60_v32, %v67_v36 }
   0xd   :  { %v69_v41 = vsel %vm48_vm2, %v28_v17, inf  ;;  %v71_v42 = vsel %vm48_vm2, %v29_v18, inf  ;;  %v73_v43 = vsel %vm48_vm2, %v30_v19, inf  ;;  %v75_v44 = vsel %vm48_vm2, %v31_v20, inf }
   0xe   :  { %v70_v45 = vmin.f32 %v62_v37, %v69_v41  ;;  %v72_v46 = vmin.f32 %v64_v38, %v71_v42  ;;  %v74_v47 = vmin.f32 %v66_v39, %v73_v43  ;;  %v76_v48 = vmin.f32 %v68_v40, %v75_v44 }
  0x10   :  { %v77_v49 = vmin.f32 %v70_v45, %v72_v46  ;;  %v78_v50 = vmin.f32 %v74_v47, %v76_v48 }
  0x12   :  { %v79_v51 = vmin.f32 %v77_v49, %v78_v50 }
  0x14   :  { %80 = vmin.xlane.f32.xlu0 %v79_v51 }
  0x87   :  { %v81_v52 = vpop.xlane.xlu0 %80 }
  0x88   :  { %v82_v53 = vrot.slane %v81_v52, 4 }
  0x8a   :  { %v83_v54 = vmin.f32 %v81_v52, %v82_v53 }
  0x8c   :  { %v84_v55 = vrot.slane %v83_v54, 2 }
  0x8e   :  { %v85_v56 = vmin.f32 %v83_v54, %v84_v55 }
  0x90   :  { %v86_v57 = vrot.slane %v85_v56, 1 }
  0x92   :  { %v87_v58 = vmin.f32 %v85_v56, %v86_v57 }
  0x94   :  { %99 = vpush %v87_v58 }
  0xc5   :  { %s100_s0 = spop %99 }
  0xc6   :  { %p89_p0 = scmp.gt.f32.partialorder %s100_s0, 0.0 }
  0xc8   :  { %s90_s10 = scalar_select %p89_p0, 1, 0 }
  0xca   :  { %v91_v59 = vstv %s90_s10 }
  0xcb   :  { %vm92_vm3 = vcmp.eq.s32.totalorder %v91_v59, 1 }
  0xcc   :  { %v93_v61 = vsel %vm92_vm3, 1, %v104_v60 }
  0xcd   :  { %94 = vst [vmem:[%s141_s1] sm:$0xff] %v93_v61 }

</bundles_post_ra>
